<compile_context>
chip_gen: v7x
topology: tpu7x:2x2x1
jax: 0.10.0
libtpu: 0.0.40
codegen_flags: <defaults>
</compile_context>

<pallas_src>
import jax
import jax.numpy as jnp
from jax.experimental import pallas as pl
from jax.experimental.pallas import tpu as pltpu


def _coff_mul_kernel(kv_ref, x_ref, o_ref):
    # kv_ref: (1, block_d) precomputed nl(k); x_ref / o_ref: (block_b, block_d).
    o_ref[...] = kv_ref[...] * x_ref[...]


def _device_kind():
    try:
        return (getattr(jax.devices()[0], "device_kind", "") or "").lower()
    except Exception:
        return ""


def _pick_fold(B, D):
    """Smallest row-group g with B % g == 0 and (g*D) % 128 == 0 (lane-dense)."""
    if D % 128 == 0:
        return 1
    for g in range(2, min(B, 128) + 1):
        if B % g == 0 and (g * D) % 128 == 0:
            return g
    return 1


def _choose_blocks(B, D, itemsize, target_bytes, num_cores):
    """Pick (block_b, block_d): prefer full rows, split batch, split D last."""
    if itemsize >= 4:
        sub = 8
    elif itemsize == 2:
        sub = 16
    else:
        sub = 32                              # int8 / fp8 pack 32 rows per vreg
    min_rows = min(sub, B)
    row_bytes = D * itemsize

    # Prefer block_d = D (contiguous DMA, 1-D grid, k fetched once). Only split
    # the feature axis when even a sublane-minimum full-row tile blows the
    # budget; then use 128-lane multiples (cdiv grid masks the ragged edge).
    if min_rows * row_bytes <= target_bytes or D <= 128:
        block_d = D
    else:
        lane_groups = max(1, target_bytes // (min_rows * itemsize * 128))
        block_d = min(lane_groups, D // 128) * 128

    cap_rows = max(min_rows, target_bytes // max(1, block_d * itemsize))
    if cap_rows >= B:
        block_b = B
        # Megacore: split only into two *equal* sublane-aligned halves, only on
        # chips with 2 TensorCores, and only when the grid would otherwise be a
        # single step.
        if num_cores >= 2 and block_d == D and B % (2 * sub) == 0:
            block_b = B // 2
    else:
        block_b = max(min_rows, (cap_rows // sub) * sub)
        block_b = min(block_b, B)
    return block_b, block_d


def coff_forward(x, k, nl=None, *, block_b=None, block_d=None,
                 target_block_bytes=None, vmem_limit_bytes=None,
                 donate_x=False):
    """out = nl(k) * x, with k of shape (1, D) broadcast over the batch of x."""
    B, D = x.shape
    assert k.shape == (1, D), (k.shape, D)
    orig_shape = x.shape

    # nl(k) once, in f32, in the wrapper (NOT the "pre-scale the big input"
    # anti-pattern: k is O(D), negligible vs the O(B*D) stream).
    kf = k.astype(jnp.float32)
    if nl == "sigmoid":
        kv = jax.nn.sigmoid(kf)
    elif nl == "tanh":
        kv = jnp.tanh(kf)
    else:
        kv = kf
    kv = kv.astype(x.dtype)

    # Lane-dense layout plumbing: fold rows so the last dim is a multiple of
    # 128 when D itself is not (e.g. (8, 32) -> (2, 128), kv tiled x4).
    fold = _pick_fold(B, D)
    if fold > 1:
        x = x.reshape(B // fold, fold * D)
        kv = jnp.tile(kv, (1, fold))
        B, D = x.shape

    kind = _device_kind()
    num_cores = 2 if "v7" in kind else 1
    if target_block_bytes is None:
        # Larger tiles amortize the ~0.35us per-grid-step overhead. Safe on all
        # generations because vmem_limit_bytes is set explicitly below.
        target_block_bytes = (6 if "v7" in kind else 4) * 1024 * 1024

    itemsize = jnp.dtype(x.dtype).itemsize
    auto_b, auto_d = _choose_blocks(B, D, itemsize, target_block_bytes, num_cores)
    if block_b is None:
        block_b = auto_b
    if block_d is None:
        block_d = auto_d
    block_b = min(block_b, B)
    block_d = min(block_d, D)

    if vmem_limit_bytes is None:
        tile_bytes = block_b * block_d * itemsize
        kv_bytes = 8 * block_d * itemsize              # (1, block_d), sublane-padded
        needed = 2 * 2 * tile_bytes + 2 * kv_bytes     # x in + out, double-buffered
        vmem_limit_bytes = min(needed + 16 * 1024 * 1024, 56 * 1024 * 1024)

    if block_d == D:
        # 1-D grid over batch tiles; kv's block index is constant so Pallas
        # fetches it once and skips the redundant DMA on later steps.
        grid = (pl.cdiv(B, block_b),)
        in_specs = [pl.BlockSpec((1, D), lambda i: (0, 0)),
                    pl.BlockSpec((block_b, D), lambda i: (i, 0))]
        out_specs = pl.BlockSpec((block_b, D), lambda i: (i, 0))
        dim_sem = ("parallel",)
    else:
        # Feature axis outer / batch inner: kv's block index is constant over
        # the inner axis (no per-inner-step kv DMA).
        grid = (pl.cdiv(D, block_d), pl.cdiv(B, block_b))
        in_specs = [pl.BlockSpec((1, block_d), lambda j, i: (0, j)),
                    pl.BlockSpec((block_b, block_d), lambda j, i: (i, j))]
        out_specs = pl.BlockSpec((block_b, block_d), lambda j, i: (i, j))
        dim_sem = ("parallel", "parallel")

    call_kwargs = {}
    if donate_x:
        call_kwargs["input_output_aliases"] = {1: 0}   # write back into x's buffer

    out = pl.pallas_call(
        _coff_mul_kernel,
        out_shape=jax.ShapeDtypeStruct((B, D), x.dtype),
        grid_spec=pltpu.PrefetchScalarGridSpec(
            num_scalar_prefetch=0,
            grid=grid,
            in_specs=in_specs,
            out_specs=out_specs,
        ),
        compiler_params=pltpu.CompilerParams(
            dimension_semantics=dim_sem,
            vmem_limit_bytes=int(vmem_limit_bytes),
        ),
        **call_kwargs,
    )(kv, x)

    if fold > 1:
        out = out.reshape(orig_shape)
    return out


if __name__ == "__main__":
    key = jax.random.PRNGKey(0)
    k1, k2, k3 = jax.random.split(key, 3)

    # Case 1: module-sized demo (batch=8, input_dims=32), sigmoid. D < 128, so
    # the wrapper folds to a lane-dense (2, 128) layout internally.
    B, D = 8, 32
    fill_val = 1.0
    x = jax.random.normal(k1, (B, D), dtype=jnp.float32)
    kp = jnp.full((1, D), fill_val, dtype=jnp.float32)   # self.k.data.fill_(fill_val)
    out = jax.block_until_ready(coff_forward(x, kp, nl="sigmoid"))
    ref = jax.nn.sigmoid(kp) * x
    assert out.shape == x.shape and out.dtype == x.dtype
    assert jnp.allclose(out, ref, atol=1e-5, rtol=1e-5)

    # Case 2: tanh, full-row tile path (and equal-halves megacore split on v7x).
    B2, D2 = 64, 256
    x2 = jax.random.normal(k2, (B2, D2), dtype=jnp.float32)
    kp2 = jnp.full((1, D2), 0.5, dtype=jnp.float32)
    out2 = jax.block_until_ready(coff_forward(x2, kp2, nl="tanh"))
    ref2 = jnp.tanh(kp2) * x2
    assert out2.shape == x2.shape and out2.dtype == x2.dtype
    assert jnp.allclose(out2, ref2, atol=1e-5, rtol=1e-5)

    # Case 3: Identity nl, forced feature-split path (feature outer / batch
    # inner grid, k block index constant over the inner axis).
    B3, D3 = 32, 512
    x3 = jax.random.normal(k3, (B3, D3), dtype=jnp.float32)
    kp3 = jnp.full((1, D3), -0.25, dtype=jnp.float32)
    out3 = jax.block_until_ready(coff_forward(x3, kp3, nl=None, block_d=256))
    ref3 = kp3 * x3
    assert out3.shape == x3.shape and out3.dtype == x3.dtype
    assert jnp.allclose(out3, ref3, atol=1e-6, rtol=1e-6)

    print("KERNEL_OK")
</pallas_src>

<mosaic_0001>
module attributes {stable_mosaic.version = 11 : i64} {
  func.func @_coff_mul_kernel(%arg0: i32, %arg1: memref<1x128xf32, #tpu.memory_space<vmem>>, %arg2: memref<2x128xf32, #tpu.memory_space<vmem>>, %arg3: memref<2x128xf32, #tpu.memory_space<vmem>>) attributes {dimension_semantics = [#tpu.dimension_semantics<parallel>], iteration_bounds = array<i64: 1>, scalar_prefetch = 0 : i64, scratch_operands = 0 : i64, tpu.core_type = #tpu.core_type<tc>, window_params = [{pipeline_mode = #tpu.pipeline_mode<synchronous>, transform_indices = @transform_0, window_bounds = array<i64: 1, 128>}, {transform_indices = @transform_1, window_bounds = array<i64: 2, 128>}, {transform_indices = @transform_2, window_bounds = array<i64: 2, 128>}]} {
    %c0 = arith.constant 0 : index
    %c0_0 = arith.constant 0 : index
    %0 = vector.load %arg1[%c0, %c0_0] : memref<1x128xf32, #tpu.memory_space<vmem>>, vector<1x128xf32>
    %c0_1 = arith.constant 0 : index
    %c0_2 = arith.constant 0 : index
    %1 = vector.load %arg2[%c0_1, %c0_2] : memref<2x128xf32, #tpu.memory_space<vmem>>, vector<2x128xf32>
    %2 = vector.broadcast %0 : vector<1x128xf32> to vector<2x128xf32>
    %3 = arith.mulf %2, %1 : vector<2x128xf32>
    %c0_3 = arith.constant 0 : index
    %c0_4 = arith.constant 0 : index
    %4 = vector.load %arg3[%c0_3, %c0_4] : memref<2x128xf32, #tpu.memory_space<vmem>>, vector<2x128xf32>
    tpu.vector_store %arg3[%c0_3, %c0_4], %3 {strides = array<i32>} : memref<2x128xf32, #tpu.memory_space<vmem>>, vector<2x128xf32>,
    return
  }
  func.func @transform_0(%arg0: i32) -> (i32, i32) {
    %c0_i32 = arith.constant 0 : i32
    %c0_i32_0 = arith.constant 0 : i32
    %c0_i32_1 = arith.constant 0 : i32
    return %c0_i32, %c0_i32_0 : i32, i32
  }
  func.func @transform_1(%arg0: i32) -> (i32, i32) {
    %c0_i32 = arith.constant 0 : i32
    %c0_i32_0 = arith.constant 0 : i32
    return %arg0, %c0_i32 : i32, i32
  }
  func.func @transform_2(%arg0: i32) -> (i32, i32) {
    %c0_i32 = arith.constant 0 : i32
    %c0_i32_0 = arith.constant 0 : i32
    return %arg0, %c0_i32 : i32, i32
  }
}

</mosaic_0001>

<bundles_post_ra>
// kernel: tpu_custom_call.1
= control target key start
LH: loop header
LB: loop body
LE: loop exit
PB: predicated region body
PF: predicated region fallthrough
CT: control target
= control target key end

     0   :  { %7 = vsyncpa [#allocation3], 0  ;;  %s144_s0 = inlined_call_operand.hbm [shape: f32[1,128], index: 0, kind: input, shape index: {}]   ;;  %s145_s1 = inlined_call_operand.vmem [shape: f32[2,128], index: 1, kind: input, shape index: {}]   ;;  %s146_s2 = inlined_call_operand.hbm [shape: f32[2,128], index: 2, kind: output, shape index: {}]  }
   0x1   :  { %8 = vsyncpa [#allocation4], 0  ;;  %s100_s9 = smov [#allocation2]   ;;  %s52_s13 = scalar_lea.hbm %s144_s0, 16 }
   0x2   :  { %s15_s10 = sshll.u32 %s100_s9, 4  ;;  %p53_p0 = scmp.ne.s32.totalorder %s144_s0, %s52_s13  ;;  %s16_s10 = int_to_ptr.vmem [resolvable:$true] %s15_s10 }
   0x3   :  { %p56_p1 = scmp.lt.u32.totalorder %s52_s13, %s144_s0 }
   0x5   :  { %p58_p2 = pnand %p56_p1, %p53_p0 }
   0x7   :  { %61 = shalt.err (!%p58_p2)
}
   0x8   :  { %s62_s18 = scalar_lea.vmem %s16_s10, 16  ;;  %s66_s19 = scalar_lea.vmem %s16_s10, 32 }
   0x9   :  { %p63_p3 = scmp.ne.s32.totalorder %s16_s10, %s62_s18  ;;  %p67_p4 = scmp.lt.s32.totalorder %s16_s10, %s16_s10 }
   0xa   :  { %p68_p5 = scmp.lt.s32.totalorder %s66_s19, %s62_s18 }
   0xc   :  { %p69_p6 = por %p68_p5, %p67_p4 }
   0xe   :  { %p70_p7 = pnand %p69_p6, %p63_p3 }
  0x10   :  { %73 = shalt.err (!%p70_p7)
}
  0x11   :  { %18 = dma.hbm_to_vmem [thread:$0]  %s144_s0, 16, %s16_s10, [#allocation3]  }
  0x12   :  { %96 = dma.done.wait [#allocation3], 16  }
  0x13   :  { %97 = vsyncadd [#allocation3], 4294967280  ;;  %s101_s22 = smov [#allocation5]   ;;  %v49_v0 = vld [vmem:[#allocation2] ss:$0 sm:$0xff] }
  0x14   :  { %s40_s23 = sshll.u32 %s101_s22, 4  ;;  %v25_v1 = vld [vmem:[%s145_s1] sm:$0x3]  ;;  %s41_s23 = int_to_ptr.vmem [resolvable:$true] %s40_s23 }
  0x15   :  { %v32_v2 = vmul.f32 %v49_v0, %v25_v1  ;;  %s74_s26 = scalar_lea.vmem %s41_s23, 32  ;;  %p79_p9 = scmp.lt.s32.totalorder %s41_s23, %s41_s23 }
  0x16   :  { %p75_p8 = scmp.ne.s32.totalorder %s41_s23, %s74_s26  ;;  %p80_p10 = scmp.lt.s32.totalorder %s74_s26, %s74_s26 }
  0x17   :  { %33 = vst [vmem:[#allocation5] sm:$0x3] %v32_v2 }
  0x18   :  { %p81_p11 = por %p80_p10, %p79_p9 }
  0x1a   :  { %p82_p12 = pnand %p81_p11, %p75_p8 }
  0x1c   :  { %85 = shalt.err (!%p82_p12)
}
  0x1d   :  { %s86_s28 = scalar_lea.hbm %s146_s2, 32 }
  0x1e   :  { %p87_p13 = scmp.ne.s32.totalorder %s146_s2, %s86_s28  ;;  %p90_p0 = scmp.lt.u32.totalorder %s86_s28, %s146_s2 }
  0x20   :  { %p92_p1 = pnand %p90_p0, %p87_p13 }
  0x22   :  { %95 = shalt.err (!%p92_p1)
}
  0x23   :  { %43 = dma.vmem_to_hbm [thread:$0]  %s41_s23, 32, %s146_s2, [#allocation4]  }
  0x24   :  { %98 = dma.done.wait [#allocation4], 32  }
  0x25   :  { %99 = vsyncadd [#allocation4], 4294967264 }
  0x26   :  { %47 = vsyncpa [#allocation3], 1 }
  0x27   :  { %48 = vsyncpa [#allocation4], 1 }

</bundles_post_ra>
